<compile_context>
chip_gen: v5e
topology: v5e:2x2
jax: 0.10.0
libtpu: 0.0.40
codegen_flags: <defaults>
</compile_context>

<pallas_src>
import math

import jax
import jax.numpy as jnp
import numpy as np
from jax.experimental import pallas as pl
from jax.experimental.pallas import tpu as pltpu


# ----------------------------------------------------------------------------------
# Pallas kernel: CBAM ChannelGate  (global avg+max pool  ->  shared MLP  ->  sigmoid
#                                   ->  per-channel rescale), fused per batch tile.
# Layout inside the kernel: (B_TILE, C, HW_pad)  ->  C on sublanes, HW_pad on lanes.
# ----------------------------------------------------------------------------------
def _channel_gate_kernel_factory(hid, hw_true, hw_pad, inv_hw):
    need_mask = (hw_pad != hw_true)

    def kernel(x_ref, w1t_ref, b1_ref, w2_ref, b2_ref, o_ref):
        # Load tile; compute in f32 even for bf16 I/O (v5e VPU has no native bf16).
        xf = x_ref[...].astype(jnp.float32)                    # (bt, C, HW_pad)

        # ---- global pooling over the spatial (lane) axis ----
        s = jnp.sum(xf, axis=2) * inv_hw                       # mean, (bt, C); zero pad is sum-neutral
        if need_mask:
            lane = jax.lax.broadcasted_iota(jnp.int32, xf.shape, 2)
            xmax_in = jnp.where(lane < hw_true, xf, -jnp.inf)  # padded lanes must not win the max
        else:
            xmax_in = xf
        m = jnp.max(xmax_in, axis=2)                           # max,  (bt, C)

        # ---- shared 2-layer MLP on the VPU (no MXU: an M=2..B_TILE matmul with hid=C/16
        #      is pure fill/drain overhead per grid step) ----
        def mlp_no_out_bias(p):                                # p: (bt, C) f32 -> (bt, C)
            acc = None
            for j in range(hid):                               # hid = C // reduction_ratio (tiny)
                # layer 1, unit j: lane-reduce of p * w1[:, j]
                hj = jnp.sum(p * w1t_ref[j:j + 1, :], axis=1, keepdims=True)   # (bt, 1)
                hj = jnp.maximum(hj + b1_ref[:, j:j + 1], 0.0)                 # ReLU
                # layer 2 contribution of unit j
                term = hj * w2_ref[j:j + 1, :]                                 # (bt, C)
                acc = term if acc is None else acc + term
            return acc

        # PyTorch sums mlp(avg)+mlp(max); the output bias b2 therefore appears twice.
        att = mlp_no_out_bias(s) + mlp_no_out_bias(m) + 2.0 * b2_ref[...]
        scale = jax.nn.sigmoid(att)                            # (bt, C)

        # ---- per-channel rescale, broadcast along the spatial lanes ----
        o_ref[...] = (xf * scale[:, :, None]).astype(o_ref.dtype)

    return kernel


def channel_gate(x, w1, b1, w2, b2, *, target_tile_bytes=4 << 20):
    """CBAM ChannelGate forward (pool_types=['avg','max']).

    x : (B, C, H, W)   f32 or bf16
    w1: (C, hid)  b1: (hid,) or (1,hid)   -- Linear(C -> hid) (weights already transposed)
    w2: (hid, C)  b2: (C,) or (1,C)       -- Linear(hid -> C)
    """
    B, C, H, W = x.shape
    HW = H * W
    hid = w1.shape[1]
    assert hid >= 1 and w1.shape == (C, hid) and w2.shape == (hid, C)

    # Lane-dense spatial axis: pad HW up to a multiple of 128 (no-op when already aligned).
    HW_pad = ((HW + 127) // 128) * 128
    x3 = x.reshape(B, C, HW)
    if HW_pad != HW:
        x3 = jnp.pad(x3, ((0, 0), (0, 0), (0, HW_pad - HW)))

    # Batch several images per grid step so each DMA/tile is ~target_tile_bytes.
    per_img = C * HW_pad * x3.dtype.itemsize
    b_tile = 1
    for d in range(1, B + 1):
        if B % d == 0 and d * per_img <= target_tile_bytes:
            b_tile = d

    # Parameters: w1 transposed so each hidden unit is a lane-dense (1, C) row.
    w1t = jnp.asarray(w1, jnp.float32).T                 # (hid, C)
    b1v = jnp.asarray(b1, jnp.float32).reshape(1, hid)   # (1, hid)
    w2v = jnp.asarray(w2, jnp.float32)                   # (hid, C)
    b2v = jnp.asarray(b2, jnp.float32).reshape(1, C)     # (1, C)

    # Explicit VMEM budget (double-buffered in+out tiles + f32 temps + headroom);
    # capped at 64 MiB so the same kernel is safe on v7x's smaller VMEM.
    tile_f32 = b_tile * C * HW_pad * 4
    vmem_limit = int(min(64 << 20, max(16 << 20, 10 * tile_f32 + (4 << 20))))

    kernel = _channel_gate_kernel_factory(hid, HW, HW_pad, 1.0 / HW)

    out = pl.pallas_call(
        kernel,
        out_shape=jax.ShapeDtypeStruct((B, C, HW_pad), x.dtype),
        grid_spec=pltpu.PrefetchScalarGridSpec(
            num_scalar_prefetch=0,
            grid=(B // b_tile,),
            in_specs=[
                pl.BlockSpec((b_tile, C, HW_pad), lambda i: (i, 0, 0)),  # x tile
                pl.BlockSpec((hid, C), lambda i: (0, 0)),                # w1^T
                pl.BlockSpec((1, hid), lambda i: (0, 0)),                # b1
                pl.BlockSpec((hid, C), lambda i: (0, 0)),                # w2
                pl.BlockSpec((1, C), lambda i: (0, 0)),                  # b2
            ],
            out_specs=pl.BlockSpec((b_tile, C, HW_pad), lambda i: (i, 0, 0)),
        ),
        compiler_params=pltpu.CompilerParams(
            # On v7x one can additionally use pltpu.CORE_PARALLEL on this axis (2 TCs/chip)
            # and pipeline_mode=pl.Buffered(3) on the x spec; kept portable here.
            dimension_semantics=("parallel",),
            vmem_limit_bytes=vmem_limit,
        ),
    )(x3, w1t, b1v, w2v, b2v)

    if HW_pad != HW:
        out = out[..., :HW]
    return out.reshape(B, C, H, W)


# ----------------------------------------------------------------------------------
# Pure-JAX references / surrounding BasicBlock ops
# ----------------------------------------------------------------------------------
def channel_gate_ref(x, w1, b1, w2, b2):
    xf = x.astype(jnp.float32)
    avg = xf.mean(axis=(2, 3))
    mx = xf.max(axis=(2, 3))
    hp = jax.lax.Precision.HIGHEST

    def mlp(p):
        h = jnp.maximum(jnp.dot(p, w1, precision=hp) + jnp.reshape(b1, (1, -1)), 0.0)
        return jnp.dot(h, w2, precision=hp) + jnp.reshape(b2, (1, -1))

    scale = jax.nn.sigmoid(mlp(avg) + mlp(mx))[:, :, None, None]
    return xf * scale


def conv2d_nchw(x, w, stride=1, padding=0):
    return jax.lax.conv_general_dilated(
        x, w, window_strides=(stride, stride),
        padding=((padding, padding), (padding, padding)),
        dimension_numbers=("NCHW", "OIHW", "NCHW"),
        precision=jax.lax.Precision.HIGHEST)


def batchnorm(x, gamma, beta, mean, var, eps=1e-5):
    inv = gamma * jax.lax.rsqrt(var + eps)
    return x * inv[None, :, None, None] + (beta - mean * inv)[None, :, None, None]


def spatial_gate(x, conv_w, gamma, beta, mean, var):
    pooled = jnp.concatenate(
        [jnp.max(x, axis=1, keepdims=True), jnp.mean(x, axis=1, keepdims=True)], axis=1)
    s = conv2d_nchw(pooled, conv_w, stride=1, padding=3)
    s = batchnorm(s, gamma, beta, mean, var)
    return x * jax.nn.sigmoid(s)


def basic_block_forward(x, p, *, use_pallas_channel_gate=True):
    """BasicBlock.forward (stride=1, downsample=None, use_cbam=True), inference-mode BN."""
    # TODO(synk): the 3x3 / 7x7 convolutions and BatchNorm run as plain XLA ops — a general
    # NCHW conv has no clean single-Pallas-kernel equivalent here; the CBAM ChannelGate
    # (global pool + shared MLP + sigmoid + channel rescale) is the fused Pallas kernel.
    residual = x
    out = conv2d_nchw(x, p["conv1_w"], stride=1, padding=1)
    out = batchnorm(out, *p["bn1"])
    out = jax.nn.relu(out)
    out = conv2d_nchw(out, p["conv2_w"], stride=1, padding=1)
    out = batchnorm(out, *p["bn2"])
    if use_pallas_channel_gate:
        out = channel_gate(out, p["cg_w1"], p["cg_b1"], p["cg_w2"], p["cg_b2"])
    else:
        out = channel_gate_ref(out, p["cg_w1"], p["cg_b1"], p["cg_w2"], p["cg_b2"])
    out = spatial_gate(out, p["sg_conv_w"], *p["sg_bn"])
    out = out + residual
    return jax.nn.relu(out)


def init_basic_block_params(keys, inplanes, planes, reduction):
    hid = planes // reduction
    k = iter(keys)

    def nrm(key, shape, scale):
        return jax.random.normal(key, shape, jnp.float32) * scale

    def bn(key, c):
        k1, k2, k3, k4 = jax.random.split(key, 4)
        return (1.0 + 0.1 * jax.random.normal(k1, (c,), jnp.float32),
                0.1 * jax.random.normal(k2, (c,), jnp.float32),
                0.1 * jax.random.normal(k3, (c,), jnp.float32),
                jax.random.uniform(k4, (c,), jnp.float32, minval=0.5, maxval=1.5))

    return dict(
        conv1_w=nrm(next(k), (planes, inplanes, 3, 3), 1.0 / math.sqrt(9 * inplanes)),
        bn1=bn(next(k), planes),
        conv2_w=nrm(next(k), (planes, planes, 3, 3), 1.0 / math.sqrt(9 * planes)),
        bn2=bn(next(k), planes),
        cg_w1=nrm(next(k), (planes, hid), 0.2),
        cg_b1=nrm(next(k), (hid,), 0.1),
        cg_w2=nrm(next(k), (hid, planes), 0.2),
        cg_b2=nrm(next(k), (planes,), 0.1),
        sg_conv_w=nrm(next(k), (1, 2, 7, 7), 1.0 / math.sqrt(2 * 49)),
        sg_bn=bn(next(k), 1),
    )


# ----------------------------------------------------------------------------------
if __name__ == "__main__":
    key = jax.random.PRNGKey(0)
    ks = jax.random.split(key, 24)

    B, C, H, W = 2, 32, 16, 16
    red = 16
    hid = C // red

    # ---- Test 1: ChannelGate Pallas kernel vs reference (f32, lane-dense HW=256) ----
    x = jax.random.normal(ks[0], (B, C, H, W), jnp.float32)
    w1 = jax.random.normal(ks[1], (C, hid), jnp.float32) * 0.2
    b1 = jax.random.normal(ks[2], (hid,), jnp.float32) * 0.1
    w2 = jax.random.normal(ks[3], (hid, C), jnp.float32) * 0.2
    b2 = jax.random.normal(ks[4], (C,), jnp.float32) * 0.1

    out = jax.block_until_ready(channel_gate(x, w1, b1, w2, b2))
    ref = channel_gate_ref(x, w1, b1, w2, b2)
    np.testing.assert_allclose(np.asarray(out), np.asarray(ref), rtol=1e-5, atol=1e-5)

    # ---- Test 2: non-128-multiple spatial size (exercises padded + masked-max path) ----
    x2 = jax.random.normal(ks[5], (4, C, 7, 7), jnp.float32)
    out2 = jax.block_until_ready(channel_gate(x2, w1, b1, w2, b2))
    ref2 = channel_gate_ref(x2, w1, b1, w2, b2)
    np.testing.assert_allclose(np.asarray(out2), np.asarray(ref2), rtol=1e-5, atol=1e-5)

    # ---- Test 3: bf16 I/O (f32 accumulation inside the kernel) ----
    xb = x.astype(jnp.bfloat16)
    out3 = jax.block_until_ready(channel_gate(xb, w1, b1, w2, b2))
    assert out3.dtype == jnp.bfloat16
    ref3 = channel_gate_ref(xb.astype(jnp.float32), w1, b1, w2, b2)
    np.testing.assert_allclose(np.asarray(out3.astype(jnp.float32)), np.asarray(ref3),
                               rtol=2e-2, atol=2e-2)

    # ---- Test 4: full BasicBlock forward with the Pallas ChannelGate inside CBAM ----
    params = init_basic_block_params(ks[6:], inplanes=C, planes=C, reduction=red)
    y_pallas = jax.block_until_ready(basic_block_forward(x, params, use_pallas_channel_gate=True))
    y_ref = basic_block_forward(x, params, use_pallas_channel_gate=False)
    assert y_pallas.shape == x.shape
    np.testing.assert_allclose(np.asarray(y_pallas), np.asarray(y_ref), rtol=1e-4, atol=1e-4)

    print("KERNEL_OK")
</pallas_src>

<mosaic_0001>
module attributes {stable_mosaic.version = 11 : i64} {
  func.func @kernel(%arg0: i32, %arg1: memref<2x32x256xf32, #tpu.memory_space<vmem>>, %arg2: memref<2x32xf32, #tpu.memory_space<vmem>>, %arg3: memref<1x2xf32, #tpu.memory_space<vmem>>, %arg4: memref<2x32xf32, #tpu.memory_space<vmem>>, %arg5: memref<1x32xf32, #tpu.memory_space<vmem>>, %arg6: memref<2x32x256xf32, #tpu.memory_space<vmem>>) attributes {dimension_semantics = [#tpu.dimension_semantics<parallel>], iteration_bounds = array<i64: 1>, scalar_prefetch = 0 : i64, scratch_operands = 0 : i64, tpu.core_type = #tpu.core_type<tc>, window_params = [{transform_indices = @transform_0, window_bounds = array<i64: 2, 32, 256>}, {pipeline_mode = #tpu.pipeline_mode<synchronous>, transform_indices = @transform_1, window_bounds = array<i64: 2, 32>}, {pipeline_mode = #tpu.pipeline_mode<synchronous>, transform_indices = @transform_2, window_bounds = array<i64: 1, 2>}, {pipeline_mode = #tpu.pipeline_mode<synchronous>, transform_indices = @transform_3, window_bounds = array<i64: 2, 32>}, {pipeline_mode = #tpu.pipeline_mode<synchronous>, transform_indices = @transform_4, window_bounds = array<i64: 1, 32>}, {transform_indices = @transform_5, window_bounds = array<i64: 2, 32, 256>}]} {
    %c0 = arith.constant 0 : index
    %c0_0 = arith.constant 0 : index
    %c0_1 = arith.constant 0 : index
    %0 = vector.load %arg1[%c0, %c0_0, %c0_1] : memref<2x32x256xf32, #tpu.memory_space<vmem>>, vector<2x32x256xf32>
    %cst = arith.constant dense<0.000000e+00> : vector<2x32xf32>
    %1 = vector.multi_reduction <add>, %0, %cst [2] : vector<2x32x256xf32> to vector<2x32xf32>
    %cst_2 = arith.constant 3.906250e-03 : f32
    %2 = vector.broadcast %cst_2 : f32 to vector<2x32xf32>
    %3 = arith.mulf %1, %2 : vector<2x32xf32>
    %cst_3 = arith.constant dense<0xFF800000> : vector<2x32xf32>
    %4 = vector.multi_reduction <maximumf>, %0, %cst_3 [2] : vector<2x32x256xf32> to vector<2x32xf32>
    %c0_4 = arith.constant 0 : index
    %c0_5 = arith.constant 0 : index
    %5 = vector.load %arg2[%c0_4, %c0_5] : memref<2x32xf32, #tpu.memory_space<vmem>>, vector<1x32xf32>
    %6 = vector.broadcast %5 : vector<1x32xf32> to vector<2x32xf32>
    %7 = arith.mulf %3, %6 : vector<2x32xf32>
    %cst_6 = arith.constant dense<0.000000e+00> : vector<2xf32>
    %8 = vector.multi_reduction <add>, %7, %cst_6 [1] : vector<2x32xf32> to vector<2xf32>
    %9 = vector.shape_cast %8 : vector<2xf32> to vector<2x1xf32>
    %c0_7 = arith.constant 0 : index
    %c0_8 = arith.constant 0 : index
    %10 = vector.load %arg3[%c0_7, %c0_8] : memref<1x2xf32, #tpu.memory_space<vmem>>, vector<1x1xf32>
    %11 = vector.broadcast %10 : vector<1x1xf32> to vector<2x1xf32>
    %12 = arith.addf %9, %11 : vector<2x1xf32>
    %cst_9 = arith.constant 0.000000e+00 : f32
    %13 = vector.broadcast %cst_9 : f32 to vector<2x1xf32>
    %14 = arith.maximumf %12, %13 : vector<2x1xf32>
    %c0_10 = arith.constant 0 : index
    %c0_11 = arith.constant 0 : index
    %15 = vector.load %arg4[%c0_10, %c0_11] : memref<2x32xf32, #tpu.memory_space<vmem>>, vector<1x32xf32>
    %16 = vector.broadcast %14 : vector<2x1xf32> to vector<2x32xf32>
    %17 = vector.broadcast %15 : vector<1x32xf32> to vector<2x32xf32>
    %18 = arith.mulf %16, %17 : vector<2x32xf32>
    %c1 = arith.constant 1 : index
    %c0_12 = arith.constant 0 : index
    %19 = vector.load %arg2[%c1, %c0_12] : memref<2x32xf32, #tpu.memory_space<vmem>>, vector<1x32xf32>
    %20 = vector.broadcast %19 : vector<1x32xf32> to vector<2x32xf32>
    %21 = arith.mulf %3, %20 : vector<2x32xf32>
    %cst_13 = arith.constant dense<0.000000e+00> : vector<2xf32>
    %22 = vector.multi_reduction <add>, %21, %cst_13 [1] : vector<2x32xf32> to vector<2xf32>
    %23 = vector.shape_cast %22 : vector<2xf32> to vector<2x1xf32>
    %c0_14 = arith.constant 0 : index
    %c1_15 = arith.constant 1 : index
    %24 = vector.load %arg3[%c0_14, %c1_15] : memref<1x2xf32, #tpu.memory_space<vmem>>, vector<1x1xf32>
    %25 = vector.broadcast %24 : vector<1x1xf32> to vector<2x1xf32>
    %26 = arith.addf %23, %25 : vector<2x1xf32>
    %cst_16 = arith.constant 0.000000e+00 : f32
    %27 = vector.broadcast %cst_16 : f32 to vector<2x1xf32>
    %28 = arith.maximumf %26, %27 : vector<2x1xf32>
    %c1_17 = arith.constant 1 : index
    %c0_18 = arith.constant 0 : index
    %29 = vector.load %arg4[%c1_17, %c0_18] : memref<2x32xf32, #tpu.memory_space<vmem>>, vector<1x32xf32>
    %30 = vector.broadcast %28 : vector<2x1xf32> to vector<2x32xf32>
    %31 = vector.broadcast %29 : vector<1x32xf32> to vector<2x32xf32>
    %32 = arith.mulf %30, %31 : vector<2x32xf32>
    %33 = arith.addf %18, %32 : vector<2x32xf32>
    %c0_19 = arith.constant 0 : index
    %c0_20 = arith.constant 0 : index
    %34 = vector.load %arg2[%c0_19, %c0_20] : memref<2x32xf32, #tpu.memory_space<vmem>>, vector<1x32xf32>
    %35 = vector.broadcast %34 : vector<1x32xf32> to vector<2x32xf32>
    %36 = arith.mulf %4, %35 : vector<2x32xf32>
    %cst_21 = arith.constant dense<0.000000e+00> : vector<2xf32>
    %37 = vector.multi_reduction <add>, %36, %cst_21 [1] : vector<2x32xf32> to vector<2xf32>
    %38 = vector.shape_cast %37 : vector<2xf32> to vector<2x1xf32>
    %c0_22 = arith.constant 0 : index
    %c0_23 = arith.constant 0 : index
    %39 = vector.load %arg3[%c0_22, %c0_23] : memref<1x2xf32, #tpu.memory_space<vmem>>, vector<1x1xf32>
    %40 = vector.broadcast %39 : vector<1x1xf32> to vector<2x1xf32>
    %41 = arith.addf %38, %40 : vector<2x1xf32>
    %cst_24 = arith.constant 0.000000e+00 : f32
    %42 = vector.broadcast %cst_24 : f32 to vector<2x1xf32>
    %43 = arith.maximumf %41, %42 : vector<2x1xf32>
    %c0_25 = arith.constant 0 : index
    %c0_26 = arith.constant 0 : index
    %44 = vector.load %arg4[%c0_25, %c0_26] : memref<2x32xf32, #tpu.memory_space<vmem>>, vector<1x32xf32>
    %45 = vector.broadcast %43 : vector<2x1xf32> to vector<2x32xf32>
    %46 = vector.broadcast %44 : vector<1x32xf32> to vector<2x32xf32>
    %47 = arith.mulf %45, %46 : vector<2x32xf32>
    %c1_27 = arith.constant 1 : index
    %c0_28 = arith.constant 0 : index
    %48 = vector.load %arg2[%c1_27, %c0_28] : memref<2x32xf32, #tpu.memory_space<vmem>>, vector<1x32xf32>
    %49 = vector.broadcast %48 : vector<1x32xf32> to vector<2x32xf32>
    %50 = arith.mulf %4, %49 : vector<2x32xf32>
    %cst_29 = arith.constant dense<0.000000e+00> : vector<2xf32>
    %51 = vector.multi_reduction <add>, %50, %cst_29 [1] : vector<2x32xf32> to vector<2xf32>
    %52 = vector.shape_cast %51 : vector<2xf32> to vector<2x1xf32>
    %c0_30 = arith.constant 0 : index
    %c1_31 = arith.constant 1 : index
    %53 = vector.load %arg3[%c0_30, %c1_31] : memref<1x2xf32, #tpu.memory_space<vmem>>, vector<1x1xf32>
    %54 = vector.broadcast %53 : vector<1x1xf32> to vector<2x1xf32>
    %55 = arith.addf %52, %54 : vector<2x1xf32>
    %cst_32 = arith.constant 0.000000e+00 : f32
    %56 = vector.broadcast %cst_32 : f32 to vector<2x1xf32>
    %57 = arith.maximumf %55, %56 : vector<2x1xf32>
    %c1_33 = arith.constant 1 : index
    %c0_34 = arith.constant 0 : index
    %58 = vector.load %arg4[%c1_33, %c0_34] : memref<2x32xf32, #tpu.memory_space<vmem>>, vector<1x32xf32>
    %59 = vector.broadcast %57 : vector<2x1xf32> to vector<2x32xf32>
    %60 = vector.broadcast %58 : vector<1x32xf32> to vector<2x32xf32>
    %61 = arith.mulf %59, %60 : vector<2x32xf32>
    %62 = arith.addf %47, %61 : vector<2x32xf32>
    %63 = arith.addf %33, %62 : vector<2x32xf32>
    %c0_35 = arith.constant 0 : index
    %c0_36 = arith.constant 0 : index
    %64 = vector.load %arg5[%c0_35, %c0_36] : memref<1x32xf32, #tpu.memory_space<vmem>>, vector<1x32xf32>
    %cst_37 = arith.constant 2.000000e+00 : f32
    %65 = vector.broadcast %cst_37 : f32 to vector<1x32xf32>
    %66 = arith.mulf %65, %64 : vector<1x32xf32>
    %67 = vector.broadcast %66 : vector<1x32xf32> to vector<2x32xf32>
    %68 = arith.addf %63, %67 : vector<2x32xf32>
    %69 = arith.negf %68 : vector<2x32xf32>
    %70 = math.exp %69 : vector<2x32xf32>
    %cst_38 = arith.constant 1.000000e+00 : f32
    %71 = vector.broadcast %cst_38 : f32 to vector<2x32xf32>
    %72 = arith.addf %71, %70 : vector<2x32xf32>
    %73 = arith.divf %71, %72 : vector<2x32xf32>
    %74 = vector.shape_cast %73 : vector<2x32xf32> to vector<2x32x1xf32>
    %75 = vector.broadcast %74 : vector<2x32x1xf32> to vector<2x32x256xf32>
    %76 = arith.mulf %0, %75 : vector<2x32x256xf32>
    %c0_39 = arith.constant 0 : index
    %c0_40 = arith.constant 0 : index
    %c0_41 = arith.constant 0 : index
    %77 = vector.load %arg6[%c0_39, %c0_40, %c0_41] : memref<2x32x256xf32, #tpu.memory_space<vmem>>, vector<2x32x256xf32>
    tpu.vector_store %arg6[%c0_39, %c0_40, %c0_41], %76 {strides = array<i32>} : memref<2x32x256xf32, #tpu.memory_space<vmem>>, vector<2x32x256xf32>,
    return
  }
  func.func @transform_0(%arg0: i32) -> (i32, i32, i32) {
    %c0_i32 = arith.constant 0 : i32
    %c0_i32_0 = arith.constant 0 : i32
    %c0_i32_1 = arith.constant 0 : i32
    return %arg0, %c0_i32, %c0_i32_0 : i32, i32, i32
  }
  func.func @transform_1(%arg0: i32) -> (i32, i32) {
    %c0_i32 = arith.constant 0 : i32
    %c0_i32_0 = arith.constant 0 : i32
    %c0_i32_1 = arith.constant 0 : i32
    return %c0_i32, %c0_i32_0 : i32, i32
  }
  func.func @transform_2(%arg0: i32) -> (i32, i32) {
    %c0_i32 = arith.constant 0 : i32
    %c0_i32_0 = arith.constant 0 : i32
    %c0_i32_1 = arith.constant 0 : i32
    return %c0_i32, %c0_i32_0 : i32, i32
  }
  func.func @transform_3(%arg0: i32) -> (i32, i32) {
    %c0_i32 = arith.constant 0 : i32
    %c0_i32_0 = arith.constant 0 : i32
    %c0_i32_1 = arith.constant 0 : i32
    return %c0_i32, %c0_i32_0 : i32, i32
  }
  func.func @transform_4(%arg0: i32) -> (i32, i32) {
    %c0_i32 = arith.constant 0 : i32
    %c0_i32_0 = arith.constant 0 : i32
    %c0_i32_1 = arith.constant 0 : i32
    return %c0_i32, %c0_i32_0 : i32, i32
  }
  func.func @transform_5(%arg0: i32) -> (i32, i32, i32) {
    %c0_i32 = arith.constant 0 : i32
    %c0_i32_0 = arith.constant 0 : i32
    %c0_i32_1 = arith.constant 0 : i32
    return %arg0, %c0_i32, %c0_i32_0 : i32, i32, i32
  }
}

</mosaic_0001>

<bundles_post_ra>
// kernel: tpu_custom_call.1
= control target key start
LH: loop header
LB: loop body
LE: loop exit
PB: predicated region body
PF: predicated region fallthrough
CT: control target
= control target key end

     0   :  { %10 = vsyncpa [#allocation3], 0  ;;  %s1028_s0 = inlined_call_operand.hbm [shape: f32[2,32,256], index: 0, kind: input, shape index: {}]   ;;  %s1029_s1 = inlined_call_operand.hbm [shape: f32[2,32], index: 1, kind: input, shape index: {}]   ;;  %s1030_s2 = inlined_call_operand.hbm [shape: f32[1,2], index: 2, kind: input, shape index: {}]   ;;  %s1031_s3 = inlined_call_operand.vmem [shape: f32[2,32], index: 3, kind: input, shape index: {}]   ;;  %s1032_s4 = inlined_call_operand.vmem [shape: f32[1,32], index: 4, kind: input, shape index: {}]   ;;  %s1033_s5 = inlined_call_operand.hbm [shape: f32[2,32,256], index: 5, kind: output, shape index: {}]  }
   0x1   :  { %11 = vsyncpa [#allocation6], 0  ;;  %s31_s20 = sshll.u32 %s1029_s1, 4  ;;  %s32_s20 = int_to_ptr.hbm [resolvable:$true] %s31_s20 }
   0x2   :  { %12 = vsyncpa [#allocation4], 0  ;;  %s755_s21 = smov [#allocation5]   ;;  %s17_s25 = sshll.u32 %s1028_s0, 4  ;;  %s18_s25 = int_to_ptr.hbm [resolvable:$true] %s17_s25 }
   0x3   :  { %s33_s22 = sshll.u32 %s755_s21, 4  ;;  %s756_s26 = smov [#allocation2]   ;;  %s34_s22 = int_to_ptr.vmem [resolvable:$true] %s33_s22 }
   0x4   :  { %36 = dma.hbm_to_vmem [thread:$0]  %s32_s20, 32, %s34_s22, [#allocation6]  }
   0x5   :  { %s19_s27 = sshll.u32 %s756_s26, 4  ;;  %s757_s28 = smov 256   ;;  %s20_s27 = int_to_ptr.vmem [resolvable:$true] %s19_s27 }
   0x6   :  { %s758_s29 = smov 16   ;;  %s42_s6 = sshll.u32 %s1030_s2, 4  ;;  %s43_s6 = int_to_ptr.hbm [resolvable:$true] %s42_s6 }
   0x7   :  { %25 = dma.hbm_to_vmem [thread:$0]  %s18_s25, 2048, %s20_s27, [#allocation3], %s757_s28, %s757_s28, %s758_s29  }
   0x8   :  { %s759_s7 = smov [#allocation7]  }
   0x9   :  { %s44_s8 = sshll.u32 %s759_s7, 4  ;;  %s45_s8 = int_to_ptr.vmem [resolvable:$true] %s44_s8 }
   0xa   :  { %47 = dma.hbm_to_vmem [thread:$0]  %s43_s6, 16, %s45_s8, [#allocation6]  }
   0xb   :  { %749 = dma.done.wait [#allocation3], 2048  }
   0xc   :  { %750 = vsyncadd [#allocation3], 4294965248 }
   0xd   :  { %751 = dma.done.wait [#allocation6], 48  }
   0xe   :  { %752 = vsyncadd [#allocation6], 4294967248  ;;  %v805_v0 = vld [vmem:[#allocation2 + $0x40] sm:$0xff]  ;;  %v807_v1 = vld [vmem:[#allocation2 + $0x48] sm:$0xff]  ;;  %v139_v19 = vlaneseq  ;;  %v760_v44 = vmov 0   ;;  %vm212_vm0 = vcmask 130112  }
   0xf   :  { %v809_v2 = vld [vmem:[#allocation2 + $0x20] sm:$0xff]  ;;  %v92_v3 = vadd.f32 %v807_v1, %v805_v0  ;;  %v813_v4 = vld [vmem:[#allocation2 + $0x28] sm:$0xff]  ;;  %v823_v9 = vld [vmem:[#allocation2 + $0x50] sm:$0xff]  ;;  %v124_v34 = vmax.f32 %v805_v0, %v807_v1  ;;  %vm216_vm1 = vcmask 195712   ;;  %vm220_vm2 = vcmask 261312   ;;  %s600_s15 = sshll.u32 %s1033_s5, 4  ;;  %s601_s15 = int_to_ptr.hbm [resolvable:$true] %s600_s15 }
  0x10   :  { %v815_v5 = vld [vmem:[#allocation2] sm:$0xff]  ;;  %v817_v6 = vld [vmem:[#allocation2 + $0x8] sm:$0xff]  ;;  %v86_v7 = vadd.f32 %v813_v4, %v809_v2  ;;  %v825_v10 = vld [vmem:[#allocation2 + $0x58] sm:$0xff]  ;;  %v850_v23 = vshrl.u32 %v139_v19, 7  ;;  %v118_v30 = vmax.f32 %v809_v2, %v813_v4  ;;  %vm229_vm3 = vcmask 1041409  }
  0x11   :  { %v80_v8 = vadd.f32 %v817_v6, %v815_v5  ;;  %93 = vadd.xlane.f32.xlu2 %v92_v3  ;;  %v827_v11 = vld [vmem:[#allocation2 + $0x30] sm:$0xff]  ;;  %v829_v12 = vld [vmem:[#allocation2 + $0x38] sm:$0xff]  ;;  %v95_v15 = vadd.f32 %v825_v10, %v823_v9  ;;  %v845_v21 = vld [vmem:[#allocation2 + $0x60] sm:$0xff]  ;;  %v112_v24 = vmax.f32 %v815_v5, %v817_v6  ;;  %v127_v33 = vmax.f32 %v823_v9, %v825_v10 }
  0x12   :  { %87 = vadd.xlane.f32.xlu1 %v86_v7  ;;  %v831_v13 = vld [vmem:[#allocation2 + $0x10] sm:$0xff]  ;;  %v833_v14 = vld [vmem:[#allocation2 + $0x18] sm:$0xff]  ;;  %v89_v16 = vadd.f32 %v829_v12, %v827_v11  ;;  %v847_v22 = vld [vmem:[#allocation2 + $0x68] sm:$0xff]  ;;  %v860_v27 = vadd.s32 8, %v850_v23  ;;  %v863_v28 = vadd.s32 16, %v850_v23  ;;  %v121_v29 = vmax.f32 %v827_v11, %v829_v12 }
  0x13   :  { %81 = vadd.xlane.f32.xlu0 %v80_v8  ;;  %v83_v17 = vadd.f32 %v833_v14, %v831_v13  ;;  %v841_v18 = vld [vmem:[#allocation2 + $0x70] sm:$0xff]  ;;  %v843_v20 = vld [vmem:[#allocation2 + $0x78] sm:$0xff]  ;;  %v98_v26 = vadd.f32 %v847_v22, %v845_v21  ;;  %623 = vset.pattern.permute.xlu1 %v850_v23  ;;  %v115_v31 = vmax.f32 %v831_v13, %v833_v14  ;;  %v644_v36 = vld [vmem:[#allocation5] ss:$0 sm:$0xff]  ;;  %v882_v37 = vadd.s32 24, %v850_v23 }
  0x14   :  { %v101_v25 = vadd.f32 %v843_v20, %v841_v18  ;;  %624 = vset.pattern.permute.xlu2 %v860_v27  ;;  %625 = vset.pattern.permute.xlu0 %v863_v28  ;;  %v130_v32 = vmax.f32 %v845_v21, %v847_v22  ;;  %v133_v35 = vmax.f32 %v841_v18, %v843_v20  ;;  %v645_v38 = vld [vmem:[#allocation5 + $0x1] ss:$0 sm:$0xff]  ;;  %vm232_vm4 = vcmask 254976  }
  0x19   :  { %96 = vadd.xlane.f32.xlu2 %v95_v15 }
  0x1a   :  { %90 = vadd.xlane.f32.xlu1 %v89_v16 }
  0x1b   :  { %84 = vadd.xlane.f32.xlu0 %v83_v17 }
  0x21   :  { %113 = vmax.xlane.f32.xlu2 %v112_v24 }
  0x22   :  { %102 = vadd.xlane.f32.xlu1 %v101_v25 }
  0x23   :  { %99 = vadd.xlane.f32.xlu0 %v98_v26 }
  0x29   :  { %122 = vmax.xlane.f32.xlu2 %v121_v29 }
  0x2a   :  { %119 = vmax.xlane.f32.xlu1 %v118_v30 }
  0x2b   :  { %116 = vmax.xlane.f32.xlu0 %v115_v31 }
  0x31   :  { %131 = vmax.xlane.f32.xlu2 %v130_v32 }
  0x32   :  { %128 = vmax.xlane.f32.xlu1 %v127_v33 }
  0x33   :  { %125 = vmax.xlane.f32.xlu0 %v124_v34 }
  0x3b   :  { %134 = vmax.xlane.f32.xlu0 %v133_v35 }
  0x49   :  { %149 = vperm.xlu2 %624, %v644_v36  }
  0x4b   :  { %143 = vperm.xlu1 %623, %v644_v36  }
  0x4f   :  { %155 = vperm.xlu0 %625, %v644_v36  }
  0x51   :  { %626 = vset.pattern.permute.xlu2 %v882_v37 }
  0x53   :  { %628 = vset.pattern.permute.xlu1 %v860_v27 }
  0x57   :  { %627 = vset.pattern.permute.xlu0 %v850_v23 }
  0x59   :  { %161 = vperm.xlu2 %626, %v644_v36  }
  0x5b   :  { %263 = vperm.xlu1 %628, %v645_v38  }
  0x5f   :  { %257 = vperm.xlu0 %627, %v645_v38  }
  0x61   :  { %632 = vset.pattern.permute.xlu2 %v760_v44 }
  0x63   :  { %629 = vset.pattern.permute.xlu1 %v863_v28 }
  0x67   :  { %630 = vset.pattern.permute.xlu0 %v882_v37 }
  0x6b   :  { %269 = vperm.xlu1 %629, %v645_v38  }
  0x6f   :  { %275 = vperm.xlu0 %630, %v645_v38  }
  0x73   :  { %631 = vset.pattern.permute.xlu1 %v760_v44 }
  0x77   :  { %633 = vset.pattern.permute.xlu0 %v760_v44 }
  0x84   :  { %v94_v39 = vpop.xlane.xlu2 %93 }
  0x85   :  { %v88_v40 = vpop.xlane.xlu1 %87  ;;  %v108_v29 = vmul.f32 0.00390625, %v94_v39 }
  0x86   :  { %v82_v41 = vpop.xlane.xlu0 %81  ;;  %v106_v38 = vmul.f32 0.00390625, %v88_v40 }
  0x87   :  { %v104_v8 = vmul.f32 0.00390625, %v82_v41 }
  0x8c   :  { %v97_v42 = vpop.xlane.xlu2 %96 }
  0x8d   :  { %v91_v43 = vpop.xlane.xlu1 %90  ;;  %v893_v53 = vmul.f32 0.00390625, %v97_v42 }
  0x8e   :  { %v85_v45 = vpop.xlane.xlu0 %84  ;;  %v107_v62 = vmul.f32 0.00390625, %v91_v43 }
  0x8f   :  { %v105_v54 = vmul.f32 0.00390625, %v85_v45 }
  0x94   :  { %v114_v46 = vpop.xlane.xlu2 %113 }
  0x95   :  { %v103_v47 = vpop.xlane.xlu1 %102 }
  0x96   :  { %v100_v48 = vpop.xlane.xlu0 %99  ;;  %v111_v45 = vmul.f32 0.00390625, %v103_v47 }
  0x97   :  { %v110_v17 = vmul.f32 0.00390625, %v100_v48 }
  0x9c   :  { %v889_v49 = vpop.xlane.xlu2 %122 }
  0x9d   :  { %v891_v50 = vpop.xlane.xlu1 %119 }
  0x9e   :  { %v117_v51 = vpop.xlane.xlu0 %116 }
  0xa4   :  { %v132_v52 = vpop.xlane.xlu2 %131 }
  0xa5   :  { %v129_v55 = vpop.xlane.xlu1 %128 }
  0xa6   :  { %v126_v61 = vpop.xlane.xlu0 %125 }
  0xac   :  { %v150_v56 = vpop.permute.xlu2 %149 }
  0xad   :  { %v168_v57 = vmul.f32 %v150_v56, %v105_v54  ;;  %v172_v58 = vmul.f32 %v150_v56, %v893_v53  ;;  %v896_v59 = vmul.f32 %v150_v56, %v117_v51  ;;  %v898_v60 = vmul.f32 %v150_v56, %v129_v55 }
  0xae   :  { %v135_v7 = vpop.xlane.xlu0 %134 }
  0xaf   :  { %187 = vperm.xlu2 %632, %v168_v57   ;;  %199 = vperm.xlu0 %633, %v172_v58  }
  0xb4   :  { %v900_v63 = vpop.permute.xlu2 %161 }
  0xb5   :  { %v170_v3 = vmul.f32 %v900_v63, %v107_v62  ;;  %v174_v56 = vmul.f32 %v900_v63, %v111_v45 }
  0xb7   :  { %193 = vperm.xlu2 %632, %v170_v3  }
  0xbd   :  { %v144_v15 = vpop.permute.xlu1 %143 }
  0xbe   :  { %v167_v16 = vmul.f32 %v144_v15, %v104_v8  ;;  %v171_v30 = vmul.f32 %v144_v15, %v108_v29  ;;  %v351_v41 = vmul.f32 %v144_v15, %v114_v46  ;;  %v355_v48 = vmul.f32 %v144_v15, %v126_v61 }
  0xc0   :  { %184 = vperm.xlu1 %631, %v167_v16  }
  0xc1   :  { %v156_v24 = vpop.permute.xlu0 %155 }
  0xc2   :  { %v173_v25 = vmul.f32 %v156_v24, %v110_v17  ;;  %v357_v26 = vmul.f32 %v156_v24, %v132_v52  ;;  %v169_v42 = vmul.f32 %v156_v24, %v106_v38  ;;  %v353_v47 = vmul.f32 %v156_v24, %v891_v50 }
  0xc4   :  { %202 = vperm.xlu2 %632, %v173_v25  }
  0xc8   :  { %196 = vperm.xlu1 %631, %v171_v30  }
  0xcd   :  { %v264_v31 = vpop.permute.xlu1 %263 }
  0xce   :  { %v419_v32 = vmul.f32 %v264_v31, %v117_v51  ;;  %v423_v33 = vmul.f32 %v264_v31, %v129_v55  ;;  %v282_v40 = vmul.f32 %v264_v31, %v105_v54  ;;  %v286_v15 = vmul.f32 %v264_v31, %v893_v53 }
  0xcf   :  { %v354_v53 = vmul.f32 %v900_v63, %v889_v49 }
  0xd1   :  { %v258_v34 = vpop.permute.xlu0 %257 }
  0xd2   :  { %v285_v35 = vmul.f32 %v258_v34, %v108_v29  ;;  %v281_v36 = vmul.f32 %v258_v34, %v104_v8  ;;  %v418_v57 = vmul.f32 %v258_v34, %v114_v46  ;;  %v422_v3 = vmul.f32 %v258_v34, %v126_v61 }
  0xd4   :  { %310 = vperm.xlu2 %632, %v285_v35   ;;  %298 = vperm.xlu1 %631, %v281_v36  }
  0xdc   :  { %368 = vperm.xlu2 %632, %v351_v41   ;;  %190 = vperm.xlu1 %631, %v169_v42  }
  0xdd   :  { %v270_v43 = vpop.permute.xlu1 %269 }
  0xde   :  { %v283_v44 = vmul.f32 %v270_v43, %v106_v38  ;;  %v287_v55 = vmul.f32 %v270_v43, %v110_v17  ;;  %v424_v58 = vmul.f32 %v270_v43, %v132_v52  ;;  %v420_v16 = vmul.f32 %v270_v43, %v891_v50 }
  0xdf   :  { %v358_v52 = vmul.f32 %v900_v63, %v135_v7 }
  0xe0   :  { %304 = vperm.xlu0 %633, %v283_v44  }
  0xe1   :  { %v276_v39 = vpop.permute.xlu0 %275 }
  0xe2   :  { %v421_v51 = vmul.f32 %v276_v39, %v889_v49  ;;  %v284_v8 = vmul.f32 %v276_v39, %v107_v62  ;;  %v288_v46 = vmul.f32 %v276_v39, %v111_v45  ;;  %v425_v54 = vmul.f32 %v276_v39, %v135_v7 }
  0xe4   :  { %380 = vperm.xlu2 %632, %v355_v48   ;;  %205 = vperm.xlu1 %631, %v174_v56  }
  0xe8   :  { %316 = vperm.xlu0 %633, %v287_v55  }
  0xec   :  { %435 = vperm.xlu2 %632, %v418_v57   ;;  %301 = vperm.xlu1 %631, %v282_v40  }
  0xf0   :  { %453 = vperm.xlu0 %633, %v424_v58  }
  0xf4   :  { %447 = vperm.xlu2 %632, %v422_v3   ;;  %307 = vperm.xlu1 %631, %v284_v8  }
  0xf8   :  { %639 = vset.pattern.permute.xlu0 %v882_v37 }
  0xfc   :  { %374 = vperm.xlu2 %632, %v353_v47   ;;  %313 = vperm.xlu1 %631, %v286_v15  }
 0x104   :  { %441 = vperm.xlu2 %632, %v420_v16   ;;  %319 = vperm.xlu1 %631, %v288_v46  }
 0x109   :  { %v188_v50 = vpop.permute.xlu2 %187 }
 0x10c   :  { %389 = vperm.xlu2 %632, %v358_v52   ;;  %371 = vperm.xlu1 %631, %v896_v59   ;;  %v915_v59 = vand.u32 127, %v139_v19 }
 0x10e   :  { %v928_v19 = vadd.s32 4294967272, %v915_v59 }
 0x111   :  { %v194_v17 = vpop.permute.xlu2 %193 }
 0x112   :  { %v219_v42 = vperm.slane %v194_v17, %v928_v19 }
 0x114   :  { %456 = vperm.xlu2 %632, %v425_v54   ;;  %383 = vperm.xlu1 %631, %v898_v60   ;;  %v918_v60 = vadd.s32 4294967288, %v915_v59 }
 0x11c   :  { %438 = vperm.xlu1 %631, %v419_v32   ;;  %v211_v32 = vperm.slane %v188_v50, %v918_v60 }
 0x11e   :  { %v203_v25 = vpop.permute.xlu2 %202 }
 0x121   :  { %v200_v29 = vpop.permute.xlu0 %199 }
 0x124   :  { %450 = vperm.xlu1 %631, %v423_v33   ;;  %v223_v33 = vperm.slane %v200_v29, %v918_v60 }
 0x12c   :  { %386 = vperm.xlu1 %631, %v357_v26   ;;  %v921_v26 = vadd.s32 4294967280, %v915_v59 }
 0x12e   :  { %v311_v49 = vpop.permute.xlu2 %310  ;;  %v225_v36 = vperm.slane %v203_v25, %v921_v26 }
 0x12f   :  { %v328_v16 = vperm.slane %v311_v49, %v915_v59 }
 0x132   :  { %v185_v61 = vpop.permute.xlu1 %184 }
 0x133   :  { %v209_v63 = vperm.slane %v185_v61, %v915_v59 }
 0x134   :  { %377 = vperm.xlu1 %631, %v354_v53  }
 0x135   :  { %v213_v34 = vsel %vm212_vm0, %v211_v32, %v209_v63 }
 0x136   :  { %v369_v56 = vpop.permute.xlu2 %368 }
 0x13a   :  { %v197_v62 = vpop.permute.xlu1 %196 }
 0x13b   :  { %v222_v30 = vperm.slane %v197_v62, %v915_v59 }
 0x13c   :  { %444 = vperm.xlu1 %631, %v421_v51  }
 0x13d   :  { %v224_v35 = vsel %vm212_vm0, %v223_v33, %v222_v30 }
 0x13e   :  { %v226_v44 = vsel %vm216_vm1, %v225_v36, %v224_v35  ;;  %v381_v57 = vpop.permute.xlu2 %380 }
 0x146   :  { %v299_v24 = vpop.permute.xlu1 %298  ;;  %v436_v8 = vpop.permute.xlu2 %435 }
 0x147   :  { %v321_v46 = vperm.slane %v299_v24, %v915_v59 }
 0x14e   :  { %v191_v7 = vpop.permute.xlu1 %190  ;;  %v448_v49 = vpop.permute.xlu2 %447 }
 0x14f   :  { %v215_v31 = vperm.slane %v191_v7, %v921_v26 }
 0x151   :  { %v217_v38 = vsel %vm216_vm1, %v215_v31, %v213_v34 }
 0x152   :  { %v221_v45 = vsel %vm220_vm2, %v219_v42, %v217_v38  ;;  %v305_v58 = vpop.permute.xlu0 %304  ;;  %v458_v38 = vperm.slane %v436_v8, %v915_v59 }
 0x153   :  { %v324_v50 = vperm.slane %v305_v58, %v921_v26 }
 0x156   :  { %v206_v41 = vpop.permute.xlu1 %205  ;;  %v375_v33 = vpop.permute.xlu2 %374 }
 0x157   :  { %v227_v43 = vperm.slane %v206_v41, %v928_v19 }
 0x159   :  { %v228_v39 = vsel %vm220_vm2, %v227_v43, %v226_v44 }
 0x15a   :  { %v230_v48 = vsel %vm229_vm3, %v228_v39, %v221_v45  ;;  %v317_v52 = vpop.permute.xlu0 %316  ;;  %v465_v39 = vperm.slane %v448_v49, %v915_v59 }
 0x15b   :  { %v233_v51 = vsel %vm232_vm4, %v230_v48, 0.0  ;;  %v331_v62 = vperm.slane %v317_v52, %v921_v26  ;;  %v394_v52 = vperm.slane %v375_v33, %v921_v26  ;;  %v646_v33 = vld [vmem:[#allocation7] ss:$0 sm:$0xff] }
 0x15c   :  { %234 = vadd.xlane.f32.xlu2 %v233_v51 }
 0x15e   :  { %v302_v55 = vpop.permute.xlu1 %301  ;;  %v442_v35 = vpop.permute.xlu2 %441 }
 0x15f   :  { %v322_v47 = vperm.slane %v302_v55, %v918_v60  ;;  %v461_v42 = vperm.slane %v442_v35, %v921_v26 }
 0x161   :  { %v323_v54 = vsel %vm212_vm0, %v322_v47, %v321_v46  ;;  %v391_v47 = vperm.slane %v369_v56, %v915_v59 }
 0x162   :  { %v325_v7 = vsel %vm216_vm1, %v324_v50, %v323_v54 }
 0x166   :  { %v308_v40 = vpop.permute.xlu1 %307 }
 0x167   :  { %v326_v53 = vperm.slane %v308_v40, %v928_v19 }
 0x169   :  { %v327_v24 = vsel %vm220_vm2, %v326_v53, %v325_v7 }
 0x16e   :  { %v314_v3 = vpop.permute.xlu1 %313 }
 0x16f   :  { %v329_v15 = vperm.slane %v314_v3, %v918_v60  ;;  %v390_v3 = vpop.permute.xlu2 %389 }
 0x171   :  { %v330_v61 = vsel %vm212_vm0, %v329_v15, %v328_v16  ;;  %v398_v15 = vperm.slane %v381_v57, %v915_v59 }
 0x172   :  { %v332_v29 = vsel %vm216_vm1, %v331_v62, %v330_v61  ;;  %v403_v61 = vperm.slane %v390_v3, %v928_v19  ;;  %v454_v62 = vpop.permute.xlu0 %453 }
 0x176   :  { %v320_v17 = vpop.permute.xlu1 %319 }
 0x177   :  { %v333_v25 = vperm.slane %v320_v17, %v928_v19  ;;  %v457_v7 = vpop.permute.xlu2 %456 }
 0x179   :  { %v334_v63 = vsel %vm220_vm2, %v333_v25, %v332_v29  ;;  %v468_v25 = vperm.slane %v454_v62, %v921_v26 }
 0x17a   :  { %v335_v30 = vsel %vm229_vm3, %v334_v63, %v327_v24  ;;  %v470_v24 = vperm.slane %v457_v7, %v928_v19 }
 0x17b   :  { %v337_v31 = vsel %vm232_vm4, %v335_v30, 0.0 }
 0x17c   :  { %338 = vadd.xlane.f32.xlu0 %v337_v31 }
 0x17e   :  { %v372_v32 = vpop.permute.xlu1 %371 }
 0x17f   :  { %v392_v40 = vperm.slane %v372_v32, %v918_v60 }
 0x181   :  { %v393_v16 = vsel %vm212_vm0, %v392_v40, %v391_v47 }
 0x182   :  { %v395_v50 = vsel %vm216_vm1, %v394_v52, %v393_v16 }
 0x186   :  { %v384_v34 = vpop.permute.xlu1 %383 }
 0x187   :  { %v399_v58 = vperm.slane %v384_v34, %v918_v60 }
 0x189   :  { %v400_v46 = vsel %vm212_vm0, %v399_v58, %v398_v15 }
 0x18e   :  { %v439_v36 = vpop.permute.xlu1 %438 }
 0x18f   :  { %v459_v41 = vperm.slane %v439_v36, %v918_v60 }
 0x191   :  { %v460_v43 = vsel %vm212_vm0, %v459_v41, %v458_v38 }
 0x192   :  { %v462_v44 = vsel %vm216_vm1, %v461_v42, %v460_v43 }
 0x196   :  { %v451_v45 = vpop.permute.xlu1 %450 }
 0x197   :  { %v466_v48 = vperm.slane %v451_v45, %v918_v60 }
 0x199   :  { %v467_v51 = vsel %vm212_vm0, %v466_v48, %v465_v39  ;;  %v647_v48 = vld [vmem:[%s1031_s3] ss:$0 sm:$0xff] }
 0x19a   :  { %v469_v49 = vsel %vm216_vm1, %v468_v25, %v467_v51  ;;  %v648_v51 = vld [vmem:[%s1031_s3 + $0x1] ss:$0 sm:$0xff]  ;;  %s762_s3 = smov [#allocation8]  }
 0x19b   :  { %v471_v31 = vsel %vm220_vm2, %v470_v24, %v469_v49 }
 0x19e   :  { %v387_v55 = vpop.permute.xlu1 %386 }
 0x19f   :  { %v401_v8 = vperm.slane %v387_v55, %v921_v26  ;;  %v761_v26 = vmov 1  }
 0x1a1   :  { %v402_v54 = vsel %vm216_vm1, %v401_v8, %v400_v46  ;;  %v487_v46 = vld [vmem:[%s1032_s4] sm:$0x1]  ;;  %s598_s4 = sshll.u32 %s762_s3, 4  ;;  %s599_s4 = int_to_ptr.vmem [resolvable:$true] %s598_s4 }
 0x1a2   :  { %v404_v59 = vsel %vm220_vm2, %v403_v61, %v402_v54  ;;  %v488_v52 = vmul.f32 2.0, %v487_v46 }
 0x1a6   :  { %v378_v53 = vpop.permute.xlu1 %377 }
 0x1a7   :  { %v396_v60 = vperm.slane %v378_v53, %v928_v19 }
 0x1a9   :  { %v397_v56 = vsel %vm220_vm2, %v396_v60, %v395_v50  ;;  %v490_v60 = vperm.slane %v488_v52, 0 }
 0x1aa   :  { %v405_v57 = vsel %vm229_vm3, %v404_v59, %v397_v56 }
 0x1ab   :  { %v407_v17 = vsel %vm232_vm4, %v405_v57, 0.0 }
 0x1ac   :  { %408 = vadd.xlane.f32.xlu0 %v407_v17 }
 0x1ae   :  { %v445_v29 = vpop.permute.xlu1 %444 }
 0x1af   :  { %v463_v63 = vperm.slane %v445_v29, %v928_v19 }
 0x1b1   :  { %v464_v30 = vsel %vm220_vm2, %v463_v63, %v462_v44 }
 0x1b2   :  { %v472_v32 = vsel %vm229_vm3, %v471_v31, %v464_v30 }
 0x1b3   :  { %v474_v19 = vsel %vm232_vm4, %v472_v32, 0.0 }
 0x1cf   :  { %v235_v34 = vpop.xlane.xlu2 %234 }
 0x1d0   :  { %v240_v35 = vadd.f32 %v646_v33, %v235_v34 }
 0x1d2   :  { %v241_v36 = vmax.f32 %v240_v35, 0.0 }
 0x1d4   :  { %245 = vperm.xlu1 %631, %v241_v36  }
 0x1dc   :  { %634 = vset.pattern.permute.xlu1 %v761_v26 }
 0x1ef   :  { %v339_v38 = vpop.xlane.xlu0 %338 }
 0x1f0   :  { %v340_v41 = vadd.f32 %v646_v33, %v339_v38 }
 0x1f2   :  { %v341_v42 = vmax.f32 %v340_v41, 0.0 }
 0x1f4   :  { %345 = vperm.xlu1 %634, %v341_v42  }
 0x1fc   :  { %641 = vset.pattern.permute.xlu1 %v860_v27 }
 0x21e   :  { %475 = vadd.xlane.f32.xlu1 %v474_v19 }
 0x21f   :  { %v409_v43 = vpop.xlane.xlu0 %408 }
 0x220   :  { %v410_v44 = vadd.f32 %v646_v33, %v409_v43 }
 0x222   :  { %v411_v45 = vmax.f32 %v410_v44, 0.0 }
 0x224   :  { %414 = vperm.xlu2 %632, %v411_v45  }
 0x22c   :  { %635 = vset.pattern.permute.xlu2 %v761_v26 }
 0x246   :  { %v246_v39 = vpop.permute.xlu1 %245 }
 0x247   :  { %v249_v40 = vmul.f32 %v647_v48, %v246_v39 }
 0x266   :  { %v346_v55 = vpop.permute.xlu1 %345 }
 0x267   :  { %v349_v58 = vmul.f32 %v648_v51, %v346_v55 }
 0x269   :  { %v350_v3 = vadd.f32 %v349_v58, %v249_v40 }
 0x27e   :  { %v415_v16 = vpop.permute.xlu2 %414 }
 0x27f   :  { %v417_v53 = vmul.f32 %v647_v48, %v415_v16 }
 0x291   :  { %v476_v8 = vpop.xlane.xlu1 %475 }
 0x292   :  { %v477_v47 = vadd.f32 %v646_v33, %v476_v8 }
 0x294   :  { %v478_v15 = vmax.f32 %v477_v47, 0.0 }
 0x296   :  { %481 = vperm.xlu2 %635, %v478_v15  }
 0x29e   :  { %636 = vset.pattern.permute.xlu2 %v850_v23 }
 0x2f0   :  { %v482_v54 = vpop.permute.xlu2 %481 }
 0x2f1   :  { %v484_v61 = vmul.f32 %v648_v51, %v482_v54 }
 0x2f3   :  { %v485_v50 = vadd.f32 %v484_v61, %v417_v53 }
 0x2f5   :  { %v486_v62 = vadd.f32 %v485_v50, %v350_v3 }
 0x2f7   :  { %v492_v56 = vadd.f32 %v490_v60, %v486_v62 }
 0x2f9   :  { %v614_v59 = vmul.f32 -1.442695, %v492_v56 }
 0x2fb   :  { %649 = vpow2.f32 %v614_v59 }
 0x301   :  { %v650_v57 = vpop.eup %649 }
 0x302   :  { %v496_v17 = vadd.f32 1.0, %v650_v57 }
 0x304   :  { %651 = vrcp.f32 %v496_v17  ;;  %v508_v49 = vand.u32 2147483648, %v496_v17  ;;  %v506_v63 = vand.u32 2147483647, %v496_v17  ;;  %vm502_vm6 = vweird.f32 %v496_v17 }
 0x306   :  { %v509_v31 = vor.u32 1.1754944e-38, %v508_v49  ;;  %vm507_vm8 = vcmp.eq.f32.partialorder %v506_v63, 8.507059e+37 }
 0x30a   :  { %v652_v25 = vpop.eup %651 }
 0x30b   :  { %v498_v7 = vmul.f32 %v652_v25, %v496_v17  ;;  %vm503_vm5 = vweird.f32 %v652_v25 }
 0x30c   :  { %vm504_vm7 = vmor %vm502_vm6, %vm503_vm5 }
 0x30d   :  { %v499_v29 = vsub.f32 1.0, %v498_v7 }
 0x30f   :  { %v500_v24 = vmul.f32 %v652_v25, %v499_v29 }
 0x311   :  { %v501_v30 = vadd.f32 %v652_v25, %v500_v24 }
 0x313   :  { %v505_v32 = vsel %vm504_vm7, %v652_v25, %v501_v30 }
 0x314   :  { %v510_v33 = vsel %vm507_vm8, %v509_v31, %v505_v32 }
 0x315   :  { %v537_v34 = vperm.slane %v510_v33, 1  ;;  %v512_v35 = vperm.slane %v510_v33, 0 }
 0x317   :  { %548 = vperm.xlu1 %641, %v537_v34   ;;  %535 = vperm.xlu0 %639, %v512_v35  }
 0x318   :  { %517 = vperm.xlu2 %636, %v512_v35  }
 0x320   :  { %637 = vset.pattern.permute.xlu2 %v860_v27 }
 0x328   :  { %523 = vperm.xlu2 %637, %v512_v35  }
 0x330   :  { %638 = vset.pattern.permute.xlu2 %v863_v28 }
 0x338   :  { %529 = vperm.xlu2 %638, %v512_v35  }
 0x340   :  { %640 = vset.pattern.permute.xlu2 %v850_v23 }
 0x348   :  { %542 = vperm.xlu2 %640, %v537_v34  }
 0x350   :  { %642 = vset.pattern.permute.xlu2 %v863_v28 }
 0x358   :  { %554 = vperm.xlu2 %642, %v537_v34  }
 0x360   :  { %643 = vset.pattern.permute.xlu2 %v882_v37 }
 0x368   :  { %560 = vperm.xlu2 %643, %v537_v34  }
 0x372   :  { %v518_v36 = vpop.permute.xlu2 %517 }
 0x373   :  { %v562_v26 = vmul.f32 %v518_v36, %v815_v5  ;;  %v563_v38 = vmul.f32 %v518_v36, %v817_v6 }
 0x375   :  { %578 = vst [vmem:[#allocation8] sm:$0xff] %v562_v26 }
 0x376   :  { %579 = vst [vmem:[#allocation8 + $0x8] sm:$0xff] %v563_v38 }
 0x382   :  { %v524_v27 = vpop.permute.xlu2 %523 }
 0x383   :  { %v564_v41 = vmul.f32 %v524_v27, %v831_v13  ;;  %v565_v42 = vmul.f32 %v524_v27, %v833_v14 }
 0x385   :  { %580 = vst [vmem:[#allocation8 + $0x10] sm:$0xff] %v564_v41 }
 0x386   :  { %581 = vst [vmem:[#allocation8 + $0x18] sm:$0xff] %v565_v42 }
 0x389   :  { %v549_v23 = vpop.permute.xlu1 %548  ;;  %v536_v28 = vpop.permute.xlu0 %535 }
 0x38a   :  { %v572_v19 = vmul.f32 %v549_v23, %v823_v9  ;;  %v573_v37 = vmul.f32 %v549_v23, %v825_v10  ;;  %v568_v43 = vmul.f32 %v536_v28, %v827_v11  ;;  %v569_v5 = vmul.f32 %v536_v28, %v829_v12 }
 0x38c   :  { %588 = vst [vmem:[#allocation8 + $0x50] sm:$0xff] %v572_v19 }
 0x38d   :  { %589 = vst [vmem:[#allocation8 + $0x58] sm:$0xff] %v573_v37 }
 0x38e   :  { %584 = vst [vmem:[#allocation8 + $0x30] sm:$0xff] %v568_v43 }
 0x38f   :  { %585 = vst [vmem:[#allocation8 + $0x38] sm:$0xff] %v569_v5 }
 0x392   :  { %v530_v6 = vpop.permute.xlu2 %529 }
 0x393   :  { %v566_v13 = vmul.f32 %v530_v6, %v809_v2  ;;  %v567_v14 = vmul.f32 %v530_v6, %v813_v4 }
 0x395   :  { %582 = vst [vmem:[#allocation8 + $0x20] sm:$0xff] %v566_v13 }
 0x396   :  { %583 = vst [vmem:[#allocation8 + $0x28] sm:$0xff] %v567_v14 }
 0x3a2   :  { %v543_v44 = vpop.permute.xlu2 %542 }
 0x3a3   :  { %v570_v9 = vmul.f32 %v543_v44, %v805_v0  ;;  %v571_v10 = vmul.f32 %v543_v44, %v807_v1 }
 0x3a5   :  { %586 = vst [vmem:[#allocation8 + $0x40] sm:$0xff] %v570_v9 }
 0x3a6   :  { %587 = vst [vmem:[#allocation8 + $0x48] sm:$0xff] %v571_v10 }
 0x3b2   :  { %v555_v11 = vpop.permute.xlu2 %554 }
 0x3b3   :  { %v574_v12 = vmul.f32 %v555_v11, %v845_v21  ;;  %v575_v45 = vmul.f32 %v555_v11, %v847_v22 }
 0x3b5   :  { %590 = vst [vmem:[#allocation8 + $0x60] sm:$0xff] %v574_v12 }
 0x3b6   :  { %591 = vst [vmem:[#allocation8 + $0x68] sm:$0xff] %v575_v45 }
 0x3c2   :  { %v561_v2 = vpop.permute.xlu2 %560 }
 0x3c3   :  { %v576_v0 = vmul.f32 %v561_v2, %v841_v18  ;;  %v577_v1 = vmul.f32 %v561_v2, %v843_v20 }
 0x3c5   :  { %592 = vst [vmem:[#allocation8 + $0x70] sm:$0xff] %v576_v0 }
 0x3c6   :  { %593 = vst [vmem:[#allocation8 + $0x78] sm:$0xff] %v577_v1 }
 0x3c7   :  { %606 = dma.vmem_to_hbm [thread:$0]  %s599_s4, 2048, %s601_s15, [#allocation4], %s757_s28, %s757_s28, %s758_s29  }
 0x3c8   :  { %753 = dma.done.wait [#allocation4], 2048  }
 0x3c9   :  { %754 = vsyncadd [#allocation4], 4294965248 }
 0x3ca   :  { %611 = vsyncpa [#allocation3], 1 }
 0x3cb   :  { %612 = vsyncpa [#allocation6], 1 }
 0x3cc   :  { %613 = vsyncpa [#allocation4], 1 }

</bundles_post_ra>
